<compile_context>
chip_gen: v6e
topology: v6e:2x2x1
jax: 0.10.0
libtpu: 0.0.40
codegen_flags: <defaults>
</compile_context>

<pallas_src>
import math

import jax
import jax.numpy as jnp
from jax.experimental import pallas as pl
from jax.experimental.pallas import tpu as pltpu

_LANE = 128
_VMEM_LIMIT_BYTES = 32 * 1024 * 1024  # explicit: safe headroom on v5e/v6e/v7x


def _exact_kernel(u_ref, r1_ref, r2_ref, w1_ref, w2_ref, w3_ref):
    # Exact PyTorch semantics: x * 0 + 1 (NaN / +-Inf inputs produce NaN).
    w1_ref[...] = u_ref[...] * 0 + 1
    w2_ref[...] = r1_ref[...] * 0 + 1
    w3_ref[...] = r2_ref[...] * 0 + 1


def _ones_kernel(w1_ref, w2_ref, w3_ref):
    # Store-only fast path: no input DMA, outputs are data-independent ones.
    one = jnp.ones(w1_ref.shape, w1_ref.dtype)
    w1_ref[...] = one
    w2_ref[...] = one
    w3_ref[...] = one


def _pick_block_rows(rows, dtype, requested=None):
    """Row-tile size for the lane-dense (rows, 128) view."""
    itemsize = jnp.dtype(dtype).itemsize
    # Packed-sublane granularity: 8 (f32/i32), 16 (bf16/f16), 32 (int8/fp8).
    gran = max(8, 32 // itemsize)
    if rows <= gran:
        return rows  # single full-extent block (block == array dims)
    if requested is None:
        # ~1 MiB per operand tile: 2048 f32 rows / 4096 bf16 rows.  Exact path
        # working set = 6 operands x 2 buffers x 1 MiB = 12 MiB (< 32 MiB limit).
        cap = max(gran, (1 << 20) // (_LANE * itemsize))
        br = min(cap, rows)
        if br >= rows:
            # Would be grid=(1,): split so both v7x TensorCores get a step.
            half = -(-rows // 2)
            br = -(-half // gran) * gran
    else:
        br = min(requested, rows)
    # Round to the packed-sublane granularity so stores stay fully packed.
    return max(gran, (br // gran) * gran)


def _run_lane_dense(inputs, rows, dtype, store_only, block_rows=None):
    """Run the kernel over a lane-dense (rows, 128) view. inputs=None => store-only."""
    br = _pick_block_rows(rows, dtype, block_rows)
    grid = (pl.cdiv(rows, br),)  # last block may be partially OOB -> masked store
    spec = pl.BlockSpec((br, _LANE), lambda i: (i, 0))
    out_sd = jax.ShapeDtypeStruct((rows, _LANE), dtype)
    itemsize = jnp.dtype(dtype).itemsize
    n_el = rows * _LANE
    cparams = pltpu.CompilerParams(
        dimension_semantics=("parallel",),
        vmem_limit_bytes=_VMEM_LIMIT_BYTES,
    )
    if store_only:
        cost = pl.CostEstimate(
            flops=0, transcendentals=0, bytes_accessed=3 * n_el * itemsize)
        return pl.pallas_call(
            _ones_kernel,
            grid=grid,
            out_shape=(out_sd, out_sd, out_sd),
            out_specs=(spec, spec, spec),
            compiler_params=cparams,
            cost_estimate=cost,
        )()
    cost = pl.CostEstimate(
        flops=6 * n_el, transcendentals=0, bytes_accessed=6 * n_el * itemsize)
    return pl.pallas_call(
        _exact_kernel,
        grid=grid,
        out_shape=(out_sd, out_sd, out_sd),
        in_specs=[spec, spec, spec],
        out_specs=(spec, spec, spec),
        compiler_params=cparams,
        cost_estimate=cost,
    )(*inputs)


def dynamic_weighted_fusion(U, R1, R2, *, assume_finite=False, block_rows=None):
    assert U.shape == R1.shape == R2.shape
    assert U.dtype == R1.dtype == R2.dtype
    shape, dtype = U.shape, U.dtype
    n = math.prod(shape)

    # Integer dtypes cannot produce NaN/Inf from x*0+1, so the store-only path
    # is always exact for them.  assume_finite=True opts floats into it too
    # (semantics change: NaN/Inf inputs no longer propagate).
    store_only = assume_finite or not jnp.issubdtype(dtype, jnp.floating)

    def _unview(w):
        return w.reshape(-1)[:n].reshape(shape)

    if store_only:
        rows = -(-n // _LANE)
        w1, w2, w3 = _run_lane_dense(None, rows, dtype, True, block_rows)
        return _unview(w1), _unview(w2), _unview(w3)

    # Exact path: inputs are read so NaN/+-Inf propagate like x*0+1.
    flats = [a.reshape(-1) for a in (U, R1, R2)]
    n_main = (n // _LANE) * _LANE

    if n_main == 0:
        # Sub-128-element inputs (the module's real B x 1 case): pad a single
        # (1, 128) block -- negligible (<128 elements per operand).
        ins = tuple(jnp.pad(f, (0, _LANE - n)).reshape(1, _LANE) for f in flats)
        w1, w2, w3 = _run_lane_dense(ins, 1, dtype, False, block_rows)
        return _unview(w1), _unview(w2), _unview(w3)

    if n_main == n:
        # 128-aligned: zero-copy lane-dense reshape, no padding at all.
        rows = n // _LANE
        ins = tuple(f.reshape(rows, _LANE) for f in flats)
        w1, w2, w3 = _run_lane_dense(ins, rows, dtype, False, block_rows)
        return w1.reshape(shape), w2.reshape(shape), w3.reshape(shape)

    # Unaligned: kernel on the 128-aligned prefix (no full-array pad copies),
    # <128-element tail finished with a tiny XLA op, then stitched back.
    rows = n_main // _LANE
    ins = tuple(f[:n_main].reshape(rows, _LANE) for f in flats)
    w1, w2, w3 = _run_lane_dense(ins, rows, dtype, False, block_rows)
    tails = tuple(f[n_main:] * 0 + 1 for f in flats)
    outs = tuple(
        jnp.concatenate([w.reshape(-1), t]).reshape(shape)
        for w, t in zip((w1, w2, w3), tails))
    return outs


if __name__ == "__main__":
    key = jax.random.PRNGKey(0)
    k_u, k_r1, k_r2 = jax.random.split(key, 3)

    # weightedFC = Linear(3, ...) implies U, R1, R2 each contribute 1 feature.
    B, F = 8, 1
    U = jax.random.normal(k_u, (B, F), jnp.float32)
    R1 = jax.random.normal(k_r1, (B, F), jnp.float32)
    R2 = jax.random.normal(k_r2, (B, F), jnp.float32)

    # Exact-semantics path.
    w1, w2, w3 = dynamic_weighted_fusion(U, R1, R2)
    jax.block_until_ready((w1, w2, w3))

    # Reference: PyTorch semantics via plain XLA.
    x = jnp.concatenate([U, R1, R2], axis=-1)
    r1, r2, r3 = jnp.split(x * 0 + 1, 3, axis=-1)
    for got, ref in ((w1, r1), (w2, r2), (w3, r3)):
        assert got.shape == ref.shape and got.dtype == U.dtype
        assert jnp.array_equal(got, ref)

    # Store-only fast path (assume_finite): identical results for finite inputs.
    f1, f2, f3 = dynamic_weighted_fusion(U, R1, R2, assume_finite=True)
    jax.block_until_ready((f1, f2, f3))
    assert jnp.array_equal(f1, r1) and jnp.array_equal(f2, r2) and jnp.array_equal(f3, r3)

    # 128-aligned bf16 path: zero-copy lane-dense reshape, >=2-step grid.
    kb = jax.random.fold_in(key, 7)
    Ub = jax.random.normal(kb, (64, 128), jnp.bfloat16)
    wb1, wb2, wb3 = dynamic_weighted_fusion(Ub, Ub, Ub)
    jax.block_until_ready((wb1, wb2, wb3))
    assert wb1.shape == Ub.shape and wb1.dtype == Ub.dtype
    assert jnp.array_equal(wb1, jnp.ones_like(Ub))
    assert jnp.array_equal(wb3, jnp.ones_like(Ub))

    # Unaligned f32 path (aligned prefix + XLA tail): check NaN/Inf propagation.
    ku = jax.random.fold_in(key, 11)
    Uu = jax.random.normal(ku, (13, 37), jnp.float32)
    Uu = Uu.at[5, 7].set(jnp.nan)      # lands in the 128-aligned prefix
    Uu = Uu.at[12, 3].set(jnp.inf)     # lands in the <128-element tail
    wu1, wu2, wu3 = dynamic_weighted_fusion(Uu, Uu + 1.0, Uu + 2.0)
    jax.block_until_ready((wu1, wu2, wu3))
    refu = Uu * 0 + 1
    assert jnp.array_equal(wu1, refu, equal_nan=True)
    assert jnp.array_equal(wu2, refu, equal_nan=True)
    assert jnp.array_equal(wu3, refu, equal_nan=True)

    print("KERNEL_OK")
</pallas_src>

<mosaic_0001>
module attributes {stable_mosaic.version = 11 : i64} {
  func.func @_exact_kernel(%arg0: i32, %arg1: memref<1x128xf32, #tpu.memory_space<vmem>>, %arg2: memref<1x128xf32, #tpu.memory_space<vmem>>, %arg3: memref<1x128xf32, #tpu.memory_space<vmem>>, %arg4: memref<1x128xf32, #tpu.memory_space<vmem>>, %arg5: memref<1x128xf32, #tpu.memory_space<vmem>>, %arg6: memref<1x128xf32, #tpu.memory_space<vmem>>) attributes {dimension_semantics = [#tpu.dimension_semantics<parallel>], iteration_bounds = array<i64: 1>, scalar_prefetch = 0 : i64, scratch_operands = 0 : i64, tpu.core_type = #tpu.core_type<tc>, window_params = [{transform_indices = @transform_0, window_bounds = array<i64: 1, 128>}, {transform_indices = @transform_1, window_bounds = array<i64: 1, 128>}, {transform_indices = @transform_2, window_bounds = array<i64: 1, 128>}, {transform_indices = @transform_3, window_bounds = array<i64: 1, 128>}, {transform_indices = @transform_4, window_bounds = array<i64: 1, 128>}, {transform_indices = @transform_5, window_bounds = array<i64: 1, 128>}]} {
    %c0 = arith.constant 0 : index
    %c0_0 = arith.constant 0 : index
    %0 = vector.load %arg1[%c0, %c0_0] : memref<1x128xf32, #tpu.memory_space<vmem>>, vector<1x128xf32>
    %cst = arith.constant 0.000000e+00 : f32
    %1 = vector.broadcast %cst : f32 to vector<1x128xf32>
    %2 = arith.mulf %0, %1 : vector<1x128xf32>
    %cst_1 = arith.constant 1.000000e+00 : f32
    %3 = vector.broadcast %cst_1 : f32 to vector<1x128xf32>
    %4 = arith.addf %2, %3 : vector<1x128xf32>
    %c0_2 = arith.constant 0 : index
    %c0_3 = arith.constant 0 : index
    %5 = vector.load %arg4[%c0_2, %c0_3] : memref<1x128xf32, #tpu.memory_space<vmem>>, vector<1x128xf32>
    tpu.vector_store %arg4[%c0_2, %c0_3], %4 {strides = array<i32>} : memref<1x128xf32, #tpu.memory_space<vmem>>, vector<1x128xf32>,
    %c0_4 = arith.constant 0 : index
    %c0_5 = arith.constant 0 : index
    %6 = vector.load %arg2[%c0_4, %c0_5] : memref<1x128xf32, #tpu.memory_space<vmem>>, vector<1x128xf32>
    %cst_6 = arith.constant 0.000000e+00 : f32
    %7 = vector.broadcast %cst_6 : f32 to vector<1x128xf32>
    %8 = arith.mulf %6, %7 : vector<1x128xf32>
    %cst_7 = arith.constant 1.000000e+00 : f32
    %9 = vector.broadcast %cst_7 : f32 to vector<1x128xf32>
    %10 = arith.addf %8, %9 : vector<1x128xf32>
    %c0_8 = arith.constant 0 : index
    %c0_9 = arith.constant 0 : index
    %11 = vector.load %arg5[%c0_8, %c0_9] : memref<1x128xf32, #tpu.memory_space<vmem>>, vector<1x128xf32>
    tpu.vector_store %arg5[%c0_8, %c0_9], %10 {strides = array<i32>} : memref<1x128xf32, #tpu.memory_space<vmem>>, vector<1x128xf32>,
    %c0_10 = arith.constant 0 : index
    %c0_11 = arith.constant 0 : index
    %12 = vector.load %arg3[%c0_10, %c0_11] : memref<1x128xf32, #tpu.memory_space<vmem>>, vector<1x128xf32>
    %cst_12 = arith.constant 0.000000e+00 : f32
    %13 = vector.broadcast %cst_12 : f32 to vector<1x128xf32>
    %14 = arith.mulf %12, %13 : vector<1x128xf32>
    %cst_13 = arith.constant 1.000000e+00 : f32
    %15 = vector.broadcast %cst_13 : f32 to vector<1x128xf32>
    %16 = arith.addf %14, %15 : vector<1x128xf32>
    %c0_14 = arith.constant 0 : index
    %c0_15 = arith.constant 0 : index
    %17 = vector.load %arg6[%c0_14, %c0_15] : memref<1x128xf32, #tpu.memory_space<vmem>>, vector<1x128xf32>
    tpu.vector_store %arg6[%c0_14, %c0_15], %16 {strides = array<i32>} : memref<1x128xf32, #tpu.memory_space<vmem>>, vector<1x128xf32>,
    return
  }
  func.func @transform_0(%arg0: i32) -> (i32, i32) {
    %c0_i32 = arith.constant 0 : i32
    %c0_i32_0 = arith.constant 0 : i32
    return %arg0, %c0_i32 : i32, i32
  }
  func.func @transform_1(%arg0: i32) -> (i32, i32) {
    %c0_i32 = arith.constant 0 : i32
    %c0_i32_0 = arith.constant 0 : i32
    return %arg0, %c0_i32 : i32, i32
  }
  func.func @transform_2(%arg0: i32) -> (i32, i32) {
    %c0_i32 = arith.constant 0 : i32
    %c0_i32_0 = arith.constant 0 : i32
    return %arg0, %c0_i32 : i32, i32
  }
  func.func @transform_3(%arg0: i32) -> (i32, i32) {
    %c0_i32 = arith.constant 0 : i32
    %c0_i32_0 = arith.constant 0 : i32
    return %arg0, %c0_i32 : i32, i32
  }
  func.func @transform_4(%arg0: i32) -> (i32, i32) {
    %c0_i32 = arith.constant 0 : i32
    %c0_i32_0 = arith.constant 0 : i32
    return %arg0, %c0_i32 : i32, i32
  }
  func.func @transform_5(%arg0: i32) -> (i32, i32) {
    %c0_i32 = arith.constant 0 : i32
    %c0_i32_0 = arith.constant 0 : i32
    return %arg0, %c0_i32 : i32, i32
  }
}

</mosaic_0001>

<bundles_post_ra>
// kernel: tpu_custom_call.1
= control target key start
LH: loop header
LB: loop body
LE: loop exit
PB: predicated region body
PF: predicated region fallthrough
CT: control target
= control target key end

     0   :  { %11 = vsyncpa [#allocation3], 0  ;;  %s227_s0 = inlined_call_operand.hbm [shape: f32[1,128], index: 0, kind: input, shape index: {}]   ;;  %s228_s1 = inlined_call_operand.vmem [shape: f32[1,128], index: 1, kind: input, shape index: {}]   ;;  %s229_s2 = inlined_call_operand.vmem [shape: f32[1,128], index: 2, kind: input, shape index: {}]   ;;  %s230_s3 = inlined_call_operand.hbm [shape: f32[1,128], index: 3, kind: output, shape index: {0}]   ;;  %s231_s4 = inlined_call_operand.hbm [shape: f32[1,128], index: 4, kind: output, shape index: {1}]   ;;  %s232_s5 = inlined_call_operand.hbm [shape: f32[1,128], index: 5, kind: output, shape index: {2}]  }
   0x1   :  { %12 = vsyncpa [#allocation4], 0 }
   0x2   :  { %13 = vsyncpa [#allocation7], 0  ;;  %s175_s18 = smov [#allocation2]  }
   0x3   :  { %s20_s19 = sshll.u32 %s175_s18, 4  ;;  %s21_s19 = int_to_ptr.vmem [resolvable:$true] %s20_s19 }
   0x4   :  { %s97_s20 = scalar_lea.vmem %s21_s19, 16  ;;  %s101_s21 = scalar_lea.vmem %s21_s19, 32 }
   0x5   :  { %p98_p0 = scmp.ne.s32.totalorder %s21_s19, %s97_s20  ;;  %p102_p1 = scmp.lt.s32.totalorder %s21_s19, %s21_s19 }
   0x6   :  { %p103_p2 = scmp.lt.s32.totalorder %s101_s21, %s97_s20 }
   0x8   :  { %p104_p3 = por %p103_p2, %p102_p1 }
   0xa   :  { %p105_p4 = pnand %p104_p3, %p98_p0 }
   0xc   :  { %108 = shalt.err (!%p105_p4)
}
   0xd   :  { %23 = dma.hbm_to_vmem [thread:$0]  %s227_s0, 16, %s21_s19, [#allocation3]  }
   0xe   :  { %169 = dma.done.wait [#allocation3], 16  }
   0xf   :  { %170 = vsyncadd [#allocation3], 4294967280  ;;  %s176_s24 = smov [#allocation6]   ;;  %v35_v0 = vld [vmem:[%s228_s1] sm:$0x1]  ;;  %s177_s30 = smov [#allocation5]  }
  0x10   :  { %s59_s25 = sshll.u32 %s176_s24, 4  ;;  %v31_v1 = vld [vmem:[#allocation2] sm:$0x1]  ;;  %v36_v3 = vmul.f32 0.0, %v35_v0  ;;  %s49_s6 = sshll.u32 %s177_s30, 4  ;;  %s60_s25 = int_to_ptr.vmem [resolvable:$true] %s59_s25  ;;  %s50_s6 = int_to_ptr.vmem [resolvable:$true] %s49_s6 }
  0x11   :  { %v39_v2 = vld [vmem:[%s229_s2] sm:$0x1]  ;;  %v32_v4 = vmul.f32 0.0, %v31_v1  ;;  %s178_s7 = smov [#allocation8]   ;;  %s109_s1 = scalar_lea.vmem %s60_s25, 16 }
  0x12   :  { %v40_v5 = vmul.f32 0.0, %v39_v2  ;;  %s69_s0 = sshll.u32 %s178_s7, 4  ;;  %v37_v6 = vadd.f32 1.0, %v36_v3  ;;  %p110_p5 = scmp.ne.s32.totalorder %s60_s25, %s109_s1  ;;  %s70_s0 = int_to_ptr.vmem [resolvable:$true] %s69_s0 }
  0x13   :  { %v33_v7 = vadd.f32 1.0, %v32_v4  ;;  %s113_s8 = scalar_lea.vmem %s60_s25, 32  ;;  %p114_p6 = scmp.lt.s32.totalorder %s60_s25, %s60_s25 }
  0x14   :  { %v41_v8 = vadd.f32 1.0, %v40_v5  ;;  %38 = vst [vmem:[#allocation6] sm:$0x1] %v37_v6  ;;  %p115_p7 = scmp.lt.s32.totalorder %s113_s8, %s109_s1 }
  0x15   :  { %34 = vst [vmem:[#allocation5] sm:$0x1] %v33_v7 }
  0x16   :  { %42 = vst [vmem:[#allocation8] sm:$0x1] %v41_v8  ;;  %p116_p8 = por %p115_p7, %p114_p6 }
  0x18   :  { %p117_p9 = pnand %p116_p8, %p110_p5 }
  0x1a   :  { %120 = shalt.err (!%p117_p9)
}
  0x1b   :  { %62 = dma.vmem_to_hbm [thread:$0]  %s60_s25, 16, %s231_s4, [#allocation7]  }
  0x1c   :  { %s129_s10 = scalar_lea.vmem %s50_s6, 16  ;;  %s133_s11 = scalar_lea.vmem %s50_s6, 32 }
  0x1d   :  { %p130_p10 = scmp.ne.s32.totalorder %s50_s6, %s129_s10  ;;  %p134_p11 = scmp.lt.s32.totalorder %s50_s6, %s50_s6 }
  0x1e   :  { %p135_p12 = scmp.lt.s32.totalorder %s133_s11, %s129_s10 }
  0x20   :  { %p136_p13 = por %p135_p12, %p134_p11 }
  0x22   :  { %p137_p0 = pnand %p136_p13, %p130_p10 }
  0x24   :  { %140 = shalt.err (!%p137_p0)
}
  0x25   :  { %52 = dma.vmem_to_hbm [thread:$0]  %s50_s6, 16, %s230_s3, [#allocation4]  }
  0x26   :  { %s149_s14 = scalar_lea.vmem %s70_s0, 16  ;;  %s153_s15 = scalar_lea.vmem %s70_s0, 32 }
  0x27   :  { %p150_p1 = scmp.ne.s32.totalorder %s70_s0, %s149_s14  ;;  %p154_p2 = scmp.lt.s32.totalorder %s70_s0, %s70_s0 }
  0x28   :  { %p155_p3 = scmp.lt.s32.totalorder %s153_s15, %s149_s14 }
  0x2a   :  { %p156_p4 = por %p155_p3, %p154_p2 }
  0x2c   :  { %p157_p5 = pnand %p156_p4, %p150_p1 }
  0x2e   :  { %160 = shalt.err (!%p157_p5)
}
  0x2f   :  { %72 = dma.vmem_to_hbm [thread:$0]  %s70_s0, 16, %s232_s5, [#allocation7]  }
  0x30   :  { %171 = dma.done.wait [#allocation4], 16  }
  0x31   :  { %172 = vsyncadd [#allocation4], 4294967280 }
  0x32   :  { %173 = dma.done.wait [#allocation7], 32  }
  0x33   :  { %174 = vsyncadd [#allocation7], 4294967264 }
  0x34   :  { %82 = vsyncpa [#allocation3], 1 }
  0x35   :  { %83 = vsyncpa [#allocation4], 1 }
  0x36   :  { %84 = vsyncpa [#allocation7], 1 }

</bundles_post_ra>
